<compile_context>
chip_gen: v5e
topology: v5e:2x2
jax: 0.10.0
libtpu: 0.0.40
codegen_flags: <defaults>
</compile_context>

<pallas_src>
import math

import jax
import jax.numpy as jnp
from jax.experimental import pallas as pl
from jax.experimental.pallas import tpu as pltpu


_LEAKY_SLOPE = 0.1  # matches nn.LeakyReLU(0.1) in the PyTorch module


def _leaky_relu(x, slope=_LEAKY_SLOPE):
    return jnp.where(x > 0, x, slope * x)


def _round_up(x, m):
    return (x + m - 1) // m * m


def attention_refine_kernel(
    att_ref, w_att_ref,                        # K-streamed attention branch
    im_ref, q_ref,                             # resident activations
    b_att_ref, w_im_ref, b_im_ref, w_q_ref, b_q_ref,
    w1_att_ref, w1_im_ref, w1_q_ref, b1_ref,   # Linear(3H -> H), split by branch
    w2_ref, b2_ref,                            # Linear(H -> out_pad), lane-dense
    out_ref,
    acc_ref,                                   # (B_pad, H) f32 accumulator
):
    k = pl.program_id(0)

    @pl.when(k == 0)
    def _init():
        acc_ref[...] = jnp.zeros_like(acc_ref)

    # Stream the huge attention-branch reduction: bf16 tiles, f32 MXU accum.
    acc_ref[...] += jnp.dot(att_ref[...], w_att_ref[...],
                            preferred_element_type=jnp.float32)

    @pl.when(k == pl.num_programs(0) - 1)
    def _finalize():
        h_att = _leaky_relu(acc_ref[...] + b_att_ref[...])
        h_im = _leaky_relu(
            jnp.dot(im_ref[...], w_im_ref[...],
                    preferred_element_type=jnp.float32) + b_im_ref[...])
        h_q = _leaky_relu(
            jnp.dot(q_ref[...], w_q_ref[...],
                    preferred_element_type=jnp.float32) + b_q_ref[...])

        # concat([h_att, h_im, h_q], dim=1) @ W1  ==  sum of per-branch matmuls
        z1 = (jnp.dot(h_att.astype(jnp.bfloat16), w1_att_ref[...],
                      preferred_element_type=jnp.float32)
              + jnp.dot(h_im.astype(jnp.bfloat16), w1_im_ref[...],
                        preferred_element_type=jnp.float32)
              + jnp.dot(h_q.astype(jnp.bfloat16), w1_q_ref[...],
                        preferred_element_type=jnp.float32)
              + b1_ref[...])
        h1 = _leaky_relu(z1)

        # Lane-dense final projection; padded bias lanes are -1e30 so their
        # softmax contribution is exactly 0.
        logits = jnp.dot(h1.astype(jnp.bfloat16), w2_ref[...],
                         preferred_element_type=jnp.float32) + b2_ref[...]

        m = jnp.max(logits, axis=-1, keepdims=True)
        e = jnp.exp(logits - m)
        s = jnp.sum(e, axis=-1, keepdims=True)
        out_ref[...] = e * pl.reciprocal(s, approx=True)


def attention_refine_forward(attention, im_feat, q_feat, params, *, tk=128):
    """attention: (B, K_att) f32; im_feat: (B, K_im); q_feat: (B, K_q)."""
    B, K_att = attention.shape
    H = params["b1"].shape[-1]
    out_pad = params["w2"].shape[-1]
    out_dim = params["out_dim"]

    # Padding: sublane-pad batch to 8, lane-pad the streamed K axis to tk.
    B_pad = _round_up(B, 8)
    tk = _round_up(min(tk, K_att), 128)
    K_pad = _round_up(K_att, tk)
    nk = K_pad // tk

    att = jnp.pad(attention, ((0, B_pad - B), (0, K_pad - K_att))).astype(jnp.bfloat16)
    im = jnp.pad(im_feat, ((0, B_pad - B), (0, 0))).astype(jnp.bfloat16)
    q = jnp.pad(q_feat, ((0, B_pad - B), (0, 0))).astype(jnp.bfloat16)
    w_att = params["w_att"]
    if w_att.shape[0] != K_pad:
        w_att = jnp.pad(w_att, ((0, K_pad - w_att.shape[0]), (0, 0)))

    operands = (
        att, w_att, im, q,
        params["b_att"], params["w_im"], params["b_im"],
        params["w_q"], params["b_q"],
        params["w1_att"], params["w1_im"], params["w1_q"], params["b1"],
        params["w2"], params["b2"],
    )

    # Advisory cost estimate so XLA can schedule around this weight-stream.
    flops = (2 * B_pad * (K_pad + im.shape[1] + q.shape[1]) * H
             + 2 * B_pad * 3 * H * H
             + 2 * B_pad * H * out_pad)
    bytes_accessed = (sum(int(x.size) * x.dtype.itemsize for x in operands)
                      + B_pad * out_pad * 4)
    cost = pl.CostEstimate(flops=flops, transcendentals=B_pad * out_pad,
                           bytes_accessed=bytes_accessed)

    resident = lambda arr: pl.BlockSpec(arr.shape, lambda k: (0, 0))

    grid_spec = pltpu.PrefetchScalarGridSpec(
        num_scalar_prefetch=0,
        grid=(nk,),
        in_specs=[
            pl.BlockSpec((B_pad, tk), lambda k: (0, k)),   # attention tiles
            pl.BlockSpec((tk, H), lambda k: (k, 0)),       # w_att tiles (streamed)
            resident(im),
            resident(q),
            resident(params["b_att"]),
            resident(params["w_im"]),
            resident(params["b_im"]),
            resident(params["w_q"]),
            resident(params["b_q"]),
            resident(params["w1_att"]),
            resident(params["w1_im"]),
            resident(params["w1_q"]),
            resident(params["b1"]),
            resident(params["w2"]),
            resident(params["b2"]),
        ],
        out_specs=pl.BlockSpec((B_pad, out_pad), lambda k: (0, 0)),
        scratch_shapes=[pltpu.VMEM((B_pad, H), jnp.float32)],
    )

    out = pl.pallas_call(
        attention_refine_kernel,
        out_shape=jax.ShapeDtypeStruct((B_pad, out_pad), jnp.float32),
        grid_spec=grid_spec,
        compiler_params=pltpu.CompilerParams(
            dimension_semantics=("arbitrary",),      # K reduction axis
            vmem_limit_bytes=48 * 1024 * 1024,       # leave headroom on v7x (64 MiB)
        ),
        cost_estimate=cost,
    )(*operands)

    # TODO(synk): on v7x an additional "parallel" batch-tile grid axis would
    # shard work across the 2 TensorCores; with B_pad=8 there is one tile only.
    return {"refined_attn": out[:B, :out_dim]}


def _linear_init(key, fan_in, fan_out):
    """PyTorch-style nn.Linear init: U(-1/sqrt(fan_in), 1/sqrt(fan_in))."""
    kw, kb = jax.random.split(key)
    bound = 1.0 / math.sqrt(fan_in)
    # Stored as (in, out) so the kernel does x @ W directly.
    w = jax.random.uniform(kw, (fan_in, fan_out), jnp.float32, -bound, bound)
    b = jax.random.uniform(kb, (1, fan_out), jnp.float32, -bound, bound)
    return w, b


def make_params(key, atten_dim, im_feat_dim, q_feat_dim, hidden, out_dim):
    keys = jax.random.split(key, 5)
    w_att, b_att = _linear_init(keys[0], atten_dim, hidden)
    w_im, b_im = _linear_init(keys[1], im_feat_dim, hidden)
    w_q, b_q = _linear_init(keys[2], q_feat_dim, hidden)
    w1, b1 = _linear_init(keys[3], 3 * hidden, hidden)
    w2, b2 = _linear_init(keys[4], hidden, out_dim)

    # Lane-dense output: pad 196 -> 256 (zero weight cols, -1e30 bias lanes).
    out_pad = _round_up(out_dim, 128)
    pad = out_pad - out_dim
    w2_p = jnp.pad(w2, ((0, 0), (0, pad)))
    b2_p = jnp.pad(b2, ((0, 0), (0, pad)), constant_values=-1e30)

    return {
        # streamed / resident matmul weights in bf16 (f32 MXU accumulation)
        "w_att": w_att.astype(jnp.bfloat16), "b_att": b_att,
        "w_im": w_im.astype(jnp.bfloat16), "b_im": b_im,
        "w_q": w_q.astype(jnp.bfloat16), "b_q": b_q,
        # split the concat-weight by branch for the fused kernel
        "w1_att": w1[:hidden].astype(jnp.bfloat16),
        "w1_im": w1[hidden:2 * hidden].astype(jnp.bfloat16),
        "w1_q": w1[2 * hidden:].astype(jnp.bfloat16),
        "b1": b1,
        "w2": w2_p.astype(jnp.bfloat16), "b2": b2_p,
        "out_dim": out_dim,
    }


def _reference(attention, im_feat, q_feat, params):
    """Pure-JAX reference using the same bf16 weights / padded softmax."""
    f32 = jnp.float32
    bf16 = jnp.bfloat16

    def lin(x, w, b):
        return jnp.dot(x.astype(bf16), w, preferred_element_type=f32) + b

    h_att = _leaky_relu(lin(attention, params["w_att"], params["b_att"]))
    h_im = _leaky_relu(lin(im_feat, params["w_im"], params["b_im"]))
    h_q = _leaky_relu(lin(q_feat, params["w_q"], params["b_q"]))
    z1 = (jnp.dot(h_att.astype(bf16), params["w1_att"], preferred_element_type=f32)
          + jnp.dot(h_im.astype(bf16), params["w1_im"], preferred_element_type=f32)
          + jnp.dot(h_q.astype(bf16), params["w1_q"], preferred_element_type=f32)
          + params["b1"])
    h1 = _leaky_relu(z1)
    logits = jnp.dot(h1.astype(bf16), params["w2"], preferred_element_type=f32) + params["b2"]
    return jax.nn.softmax(logits, axis=-1)[:, :params["out_dim"]]


if __name__ == "__main__":
    # Small shapes consistent with the module's interface (feature dims kept
    # lane-friendly; the attention dim is large enough to exercise K-tiling).
    B = 2
    ATTEN_DIM = 512       # stands in for 4*12*115*115 (streamed over K)
    IM_FEAT_DIM = 256     # stands in for 36*2048 (kept resident)
    Q_FEAT_DIM = 128      # stands in for 300 (kept resident)
    HIDDEN = 128
    OUT_DIM = 14 * 14     # 196, padded to 256 lanes inside the kernel

    key = jax.random.PRNGKey(0)
    k_att, k_im, k_q, k_params = jax.random.split(key, 4)

    attention = jax.random.normal(k_att, (B, ATTEN_DIM), jnp.float32)
    im_feat = jax.random.normal(k_im, (B, IM_FEAT_DIM), jnp.float32)
    q_feat = jax.random.normal(k_q, (B, Q_FEAT_DIM), jnp.float32)

    params = make_params(k_params, ATTEN_DIM, IM_FEAT_DIM, Q_FEAT_DIM, HIDDEN, OUT_DIM)

    out = attention_refine_forward(attention, im_feat, q_feat, params, tk=128)
    refined = jax.block_until_ready(out["refined_attn"])

    # Sanity: shape, softmax rows sum to ~1, matches a pure-JAX reference.
    assert refined.shape == (B, OUT_DIM)
    row_sums = jnp.sum(refined, axis=-1)
    assert bool(jnp.all(jnp.abs(row_sums - 1.0) < 1e-2)), row_sums

    ref = _reference(attention, im_feat, q_feat, params)
    assert bool(jnp.allclose(refined, ref, rtol=5e-2, atol=1e-4))

    print("KERNEL_OK")
</pallas_src>

<mosaic_0001>
module attributes {stable_mosaic.version = 11 : i64} {
  func.func @attention_refine_kernel(%arg0: i32, %arg1: memref<8x128xbf16, #tpu.memory_space<vmem>>, %arg2: memref<128x128xbf16, #tpu.memory_space<vmem>>, %arg3: memref<8x256xbf16, #tpu.memory_space<vmem>>, %arg4: memref<8x128xbf16, #tpu.memory_space<vmem>>, %arg5: memref<1x128xf32, #tpu.memory_space<vmem>>, %arg6: memref<256x128xbf16, #tpu.memory_space<vmem>>, %arg7: memref<1x128xf32, #tpu.memory_space<vmem>>, %arg8: memref<128x128xbf16, #tpu.memory_space<vmem>>, %arg9: memref<1x128xf32, #tpu.memory_space<vmem>>, %arg10: memref<128x128xbf16, #tpu.memory_space<vmem>>, %arg11: memref<128x128xbf16, #tpu.memory_space<vmem>>, %arg12: memref<128x128xbf16, #tpu.memory_space<vmem>>, %arg13: memref<1x128xf32, #tpu.memory_space<vmem>>, %arg14: memref<128x256xbf16, #tpu.memory_space<vmem>>, %arg15: memref<1x256xf32, #tpu.memory_space<vmem>>, %arg16: memref<8x256xf32, #tpu.memory_space<vmem>>, %arg17: memref<8x128xf32, #tpu.memory_space<vmem>>) attributes {dimension_semantics = [#tpu.dimension_semantics<arbitrary>], iteration_bounds = array<i64: 4>, scalar_prefetch = 0 : i64, scratch_operands = 1 : i64, tpu.core_type = #tpu.core_type<tc>, window_params = [{transform_indices = @transform_0, window_bounds = array<i64: 8, 128>}, {transform_indices = @transform_1, window_bounds = array<i64: 128, 128>}, {pipeline_mode = #tpu.pipeline_mode<synchronous>, transform_indices = @transform_2, window_bounds = array<i64: 8, 256>}, {pipeline_mode = #tpu.pipeline_mode<synchronous>, transform_indices = @transform_3, window_bounds = array<i64: 8, 128>}, {pipeline_mode = #tpu.pipeline_mode<synchronous>, transform_indices = @transform_4, window_bounds = array<i64: 1, 128>}, {pipeline_mode = #tpu.pipeline_mode<synchronous>, transform_indices = @transform_5, window_bounds = array<i64: 256, 128>}, {pipeline_mode = #tpu.pipeline_mode<synchronous>, transform_indices = @transform_6, window_bounds = array<i64: 1, 128>}, {pipeline_mode = #tpu.pipeline_mode<synchronous>, transform_indices = @transform_7, window_bounds = array<i64: 128, 128>}, {pipeline_mode = #tpu.pipeline_mode<synchronous>, transform_indices = @transform_8, window_bounds = array<i64: 1, 128>}, {pipeline_mode = #tpu.pipeline_mode<synchronous>, transform_indices = @transform_9, window_bounds = array<i64: 128, 128>}, {pipeline_mode = #tpu.pipeline_mode<synchronous>, transform_indices = @transform_10, window_bounds = array<i64: 128, 128>}, {pipeline_mode = #tpu.pipeline_mode<synchronous>, transform_indices = @transform_11, window_bounds = array<i64: 128, 128>}, {pipeline_mode = #tpu.pipeline_mode<synchronous>, transform_indices = @transform_12, window_bounds = array<i64: 1, 128>}, {pipeline_mode = #tpu.pipeline_mode<synchronous>, transform_indices = @transform_13, window_bounds = array<i64: 128, 256>}, {pipeline_mode = #tpu.pipeline_mode<synchronous>, transform_indices = @transform_14, window_bounds = array<i64: 1, 256>}, {pipeline_mode = #tpu.pipeline_mode<synchronous>, transform_indices = @transform_15, window_bounds = array<i64: 8, 256>}]} {
    %c0_i32 = arith.constant 0 : i32
    %0 = arith.cmpi eq, %arg0, %c0_i32 : i32
    %1 = arith.extui %0 : i1 to i32
    %c0_i32_0 = arith.constant 0 : i32
    %2 = arith.cmpi ne, %1, %c0_i32_0 : i32
    scf.if %2 {
      %cst_9 = arith.constant 0.000000e+00 : f32
      %12 = vector.broadcast %cst_9 : f32 to vector<8x128xf32>
      %c0_10 = arith.constant 0 : index
      %c0_11 = arith.constant 0 : index
      %13 = vector.load %arg17[%c0_10, %c0_11] : memref<8x128xf32, #tpu.memory_space<vmem>>, vector<8x128xf32>
      tpu.vector_store %arg17[%c0_10, %c0_11], %12 {strides = array<i32>} : memref<8x128xf32, #tpu.memory_space<vmem>>, vector<8x128xf32>,
    } else {
    }
    %c0 = arith.constant 0 : index
    %c0_1 = arith.constant 0 : index
    %3 = vector.load %arg17[%c0, %c0_1] : memref<8x128xf32, #tpu.memory_space<vmem>>, vector<8x128xf32>
    %c0_2 = arith.constant 0 : index
    %c0_3 = arith.constant 0 : index
    %4 = vector.load %arg1[%c0_2, %c0_3] : memref<8x128xbf16, #tpu.memory_space<vmem>>, vector<8x128xbf16>
    %c0_4 = arith.constant 0 : index
    %c0_5 = arith.constant 0 : index
    %5 = vector.load %arg2[%c0_4, %c0_5] : memref<128x128xbf16, #tpu.memory_space<vmem>>, vector<128x128xbf16>
    %cst = arith.constant dense<0.000000e+00> : vector<8x128xf32>
    %6 = tpu.matmul %4, %5, %cst {dimension_numbers = #tpu.dot_dimension_numbers<[1], [0], [0], [1], [0, 0, 1, 1], [], []>} : vector<8x128xbf16>, vector<128x128xbf16>, vector<8x128xf32> -> vector<8x128xf32>
    %7 = arith.addf %3, %6 : vector<8x128xf32>
    %c0_6 = arith.constant 0 : index
    %c0_7 = arith.constant 0 : index
    %8 = vector.load %arg17[%c0_6, %c0_7] : memref<8x128xf32, #tpu.memory_space<vmem>>, vector<8x128xf32>
    tpu.vector_store %arg17[%c0_6, %c0_7], %7 {strides = array<i32>} : memref<8x128xf32, #tpu.memory_space<vmem>>, vector<8x128xf32>,
    %c3_i32 = arith.constant 3 : i32
    %9 = arith.cmpi eq, %arg0, %c3_i32 : i32
    %10 = arith.extui %9 : i1 to i32
    %c0_i32_8 = arith.constant 0 : i32
    %11 = arith.cmpi ne, %10, %c0_i32_8 : i32
    scf.if %11 {
      %c0_9 = arith.constant 0 : index
      %c0_10 = arith.constant 0 : index
      %12 = vector.load %arg17[%c0_9, %c0_10] : memref<8x128xf32, #tpu.memory_space<vmem>>, vector<8x128xf32>
      %c0_11 = arith.constant 0 : index
      %c0_12 = arith.constant 0 : index
      %13 = vector.load %arg5[%c0_11, %c0_12] : memref<1x128xf32, #tpu.memory_space<vmem>>, vector<1x128xf32>
      %14 = vector.broadcast %13 : vector<1x128xf32> to vector<8x128xf32>
      %15 = arith.addf %12, %14 : vector<8x128xf32>
      %cst_13 = arith.constant 0.000000e+00 : f32
      %16 = vector.broadcast %cst_13 : f32 to vector<8x128xf32>
      %17 = arith.cmpf ogt, %15, %16 : vector<8x128xf32>
      %cst_14 = arith.constant 1.000000e-01 : f32
      %18 = vector.broadcast %cst_14 : f32 to vector<8x128xf32>
      %19 = arith.mulf %18, %15 : vector<8x128xf32>
      %20 = arith.select %17, %15, %19 : vector<8x128xi1>, vector<8x128xf32>
      %c0_15 = arith.constant 0 : index
      %c0_16 = arith.constant 0 : index
      %21 = vector.load %arg3[%c0_15, %c0_16] : memref<8x256xbf16, #tpu.memory_space<vmem>>, vector<8x256xbf16>
      %c0_17 = arith.constant 0 : index
      %c0_18 = arith.constant 0 : index
      %22 = vector.load %arg6[%c0_17, %c0_18] : memref<256x128xbf16, #tpu.memory_space<vmem>>, vector<256x128xbf16>
      %cst_19 = arith.constant dense<0.000000e+00> : vector<8x128xf32>
      %23 = tpu.matmul %21, %22, %cst_19 {dimension_numbers = #tpu.dot_dimension_numbers<[1], [0], [0], [1], [0, 0, 1, 1], [], []>} : vector<8x256xbf16>, vector<256x128xbf16>, vector<8x128xf32> -> vector<8x128xf32>
      %c0_20 = arith.constant 0 : index
      %c0_21 = arith.constant 0 : index
      %24 = vector.load %arg7[%c0_20, %c0_21] : memref<1x128xf32, #tpu.memory_space<vmem>>, vector<1x128xf32>
      %25 = vector.broadcast %24 : vector<1x128xf32> to vector<8x128xf32>
      %26 = arith.addf %23, %25 : vector<8x128xf32>
      %cst_22 = arith.constant 0.000000e+00 : f32
      %27 = vector.broadcast %cst_22 : f32 to vector<8x128xf32>
      %28 = arith.cmpf ogt, %26, %27 : vector<8x128xf32>
      %cst_23 = arith.constant 1.000000e-01 : f32
      %29 = vector.broadcast %cst_23 : f32 to vector<8x128xf32>
      %30 = arith.mulf %29, %26 : vector<8x128xf32>
      %31 = arith.select %28, %26, %30 : vector<8x128xi1>, vector<8x128xf32>
      %c0_24 = arith.constant 0 : index
      %c0_25 = arith.constant 0 : index
      %32 = vector.load %arg4[%c0_24, %c0_25] : memref<8x128xbf16, #tpu.memory_space<vmem>>, vector<8x128xbf16>
      %c0_26 = arith.constant 0 : index
      %c0_27 = arith.constant 0 : index
      %33 = vector.load %arg8[%c0_26, %c0_27] : memref<128x128xbf16, #tpu.memory_space<vmem>>, vector<128x128xbf16>
      %cst_28 = arith.constant dense<0.000000e+00> : vector<8x128xf32>
      %34 = tpu.matmul %32, %33, %cst_28 {dimension_numbers = #tpu.dot_dimension_numbers<[1], [0], [0], [1], [0, 0, 1, 1], [], []>} : vector<8x128xbf16>, vector<128x128xbf16>, vector<8x128xf32> -> vector<8x128xf32>
      %c0_29 = arith.constant 0 : index
      %c0_30 = arith.constant 0 : index
      %35 = vector.load %arg9[%c0_29, %c0_30] : memref<1x128xf32, #tpu.memory_space<vmem>>, vector<1x128xf32>
      %36 = vector.broadcast %35 : vector<1x128xf32> to vector<8x128xf32>
      %37 = arith.addf %34, %36 : vector<8x128xf32>
      %cst_31 = arith.constant 0.000000e+00 : f32
      %38 = vector.broadcast %cst_31 : f32 to vector<8x128xf32>
      %39 = arith.cmpf ogt, %37, %38 : vector<8x128xf32>
      %cst_32 = arith.constant 1.000000e-01 : f32
      %40 = vector.broadcast %cst_32 : f32 to vector<8x128xf32>
      %41 = arith.mulf %40, %37 : vector<8x128xf32>
      %42 = arith.select %39, %37, %41 : vector<8x128xi1>, vector<8x128xf32>
      %43 = arith.truncf %20 : vector<8x128xf32> to vector<8x128xbf16>
      %c0_33 = arith.constant 0 : index
      %c0_34 = arith.constant 0 : index
      %44 = vector.load %arg10[%c0_33, %c0_34] : memref<128x128xbf16, #tpu.memory_space<vmem>>, vector<128x128xbf16>
      %cst_35 = arith.constant dense<0.000000e+00> : vector<8x128xf32>
      %45 = tpu.matmul %43, %44, %cst_35 {dimension_numbers = #tpu.dot_dimension_numbers<[1], [0], [0], [1], [0, 0, 1, 1], [], []>} : vector<8x128xbf16>, vector<128x128xbf16>, vector<8x128xf32> -> vector<8x128xf32>
      %46 = arith.truncf %31 : vector<8x128xf32> to vector<8x128xbf16>
      %c0_36 = arith.constant 0 : index
      %c0_37 = arith.constant 0 : index
      %47 = vector.load %arg11[%c0_36, %c0_37] : memref<128x128xbf16, #tpu.memory_space<vmem>>, vector<128x128xbf16>
      %cst_38 = arith.constant dense<0.000000e+00> : vector<8x128xf32>
      %48 = tpu.matmul %46, %47, %cst_38 {dimension_numbers = #tpu.dot_dimension_numbers<[1], [0], [0], [1], [0, 0, 1, 1], [], []>} : vector<8x128xbf16>, vector<128x128xbf16>, vector<8x128xf32> -> vector<8x128xf32>
      %49 = arith.addf %45, %48 : vector<8x128xf32>
      %50 = arith.truncf %42 : vector<8x128xf32> to vector<8x128xbf16>
      %c0_39 = arith.constant 0 : index
      %c0_40 = arith.constant 0 : index
      %51 = vector.load %arg12[%c0_39, %c0_40] : memref<128x128xbf16, #tpu.memory_space<vmem>>, vector<128x128xbf16>
      %cst_41 = arith.constant dense<0.000000e+00> : vector<8x128xf32>
      %52 = tpu.matmul %50, %51, %cst_41 {dimension_numbers = #tpu.dot_dimension_numbers<[1], [0], [0], [1], [0, 0, 1, 1], [], []>} : vector<8x128xbf16>, vector<128x128xbf16>, vector<8x128xf32> -> vector<8x128xf32>
      %53 = arith.addf %49, %52 : vector<8x128xf32>
      %c0_42 = arith.constant 0 : index
      %c0_43 = arith.constant 0 : index
      %54 = vector.load %arg13[%c0_42, %c0_43] : memref<1x128xf32, #tpu.memory_space<vmem>>, vector<1x128xf32>
      %55 = vector.broadcast %54 : vector<1x128xf32> to vector<8x128xf32>
      %56 = arith.addf %53, %55 : vector<8x128xf32>
      %cst_44 = arith.constant 0.000000e+00 : f32
      %57 = vector.broadcast %cst_44 : f32 to vector<8x128xf32>
      %58 = arith.cmpf ogt, %56, %57 : vector<8x128xf32>
      %cst_45 = arith.constant 1.000000e-01 : f32
      %59 = vector.broadcast %cst_45 : f32 to vector<8x128xf32>
      %60 = arith.mulf %59, %56 : vector<8x128xf32>
      %61 = arith.select %58, %56, %60 : vector<8x128xi1>, vector<8x128xf32>
      %62 = arith.truncf %61 : vector<8x128xf32> to vector<8x128xbf16>
      %c0_46 = arith.constant 0 : index
      %c0_47 = arith.constant 0 : index
      %63 = vector.load %arg14[%c0_46, %c0_47] : memref<128x256xbf16, #tpu.memory_space<vmem>>, vector<128x256xbf16>
      %cst_48 = arith.constant dense<0.000000e+00> : vector<8x256xf32>
      %64 = tpu.matmul %62, %63, %cst_48 {dimension_numbers = #tpu.dot_dimension_numbers<[1], [0], [0], [1], [0, 0, 1, 1], [], []>} : vector<8x128xbf16>, vector<128x256xbf16>, vector<8x256xf32> -> vector<8x256xf32>
      %c0_49 = arith.constant 0 : index
      %c0_50 = arith.constant 0 : index
      %65 = vector.load %arg15[%c0_49, %c0_50] : memref<1x256xf32, #tpu.memory_space<vmem>>, vector<1x256xf32>
      %66 = vector.broadcast %65 : vector<1x256xf32> to vector<8x256xf32>
      %67 = arith.addf %64, %66 : vector<8x256xf32>
      %cst_51 = arith.constant dense<0xFF800000> : vector<8xf32>
      %68 = vector.multi_reduction <maximumf>, %67, %cst_51 [1] : vector<8x256xf32> to vector<8xf32>
      %69 = vector.shape_cast %68 : vector<8xf32> to vector<8x1xf32>
      %70 = vector.broadcast %69 : vector<8x1xf32> to vector<8x256xf32>
      %71 = arith.subf %67, %70 : vector<8x256xf32>
      %72 = math.exp %71 : vector<8x256xf32>
      %cst_52 = arith.constant dense<0.000000e+00> : vector<8xf32>
      %73 = vector.multi_reduction <add>, %72, %cst_52 [1] : vector<8x256xf32> to vector<8xf32>
      %74 = vector.shape_cast %73 : vector<8xf32> to vector<8x1xf32>
      %75 = tpu.reciprocal %74 {approx = true} : vector<8x1xf32> -> vector<8x1xf32>
      %76 = vector.broadcast %75 : vector<8x1xf32> to vector<8x256xf32>
      %77 = arith.mulf %72, %76 : vector<8x256xf32>
      %c0_53 = arith.constant 0 : index
      %c0_54 = arith.constant 0 : index
      %78 = vector.load %arg16[%c0_53, %c0_54] : memref<8x256xf32, #tpu.memory_space<vmem>>, vector<8x256xf32>
      tpu.vector_store %arg16[%c0_53, %c0_54], %77 {strides = array<i32>} : memref<8x256xf32, #tpu.memory_space<vmem>>, vector<8x256xf32>,
    } else {
    }
    return
  }
  func.func @transform_0(%arg0: i32) -> (i32, i32) {
    %c0_i32 = arith.constant 0 : i32
    %c0_i32_0 = arith.constant 0 : i32
    return %c0_i32, %arg0 : i32, i32
  }
  func.func @transform_1(%arg0: i32) -> (i32, i32) {
    %c0_i32 = arith.constant 0 : i32
    %c0_i32_0 = arith.constant 0 : i32
    return %arg0, %c0_i32 : i32, i32
  }
  func.func @transform_2(%arg0: i32) -> (i32, i32) {
    %c0_i32 = arith.constant 0 : i32
    %c0_i32_0 = arith.constant 0 : i32
    %c0_i32_1 = arith.constant 0 : i32
    return %c0_i32, %c0_i32_0 : i32, i32
  }
  func.func @transform_3(%arg0: i32) -> (i32, i32) {
    %c0_i32 = arith.constant 0 : i32
    %c0_i32_0 = arith.constant 0 : i32
    %c0_i32_1 = arith.constant 0 : i32
    return %c0_i32, %c0_i32_0 : i32, i32
  }
  func.func @transform_4(%arg0: i32) -> (i32, i32) {
    %c0_i32 = arith.constant 0 : i32
    %c0_i32_0 = arith.constant 0 : i32
    %c0_i32_1 = arith.constant 0 : i32
    return %c0_i32, %c0_i32_0 : i32, i32
  }
  func.func @transform_5(%arg0: i32) -> (i32, i32) {
    %c0_i32 = arith.constant 0 : i32
    %c0_i32_0 = arith.constant 0 : i32
    %c0_i32_1 = arith.constant 0 : i32
    return %c0_i32, %c0_i32_0 : i32, i32
  }
  func.func @transform_6(%arg0: i32) -> (i32, i32) {
    %c0_i32 = arith.constant 0 : i32
    %c0_i32_0 = arith.constant 0 : i32
    %c0_i32_1 = arith.constant 0 : i32
    return %c0_i32, %c0_i32_0 : i32, i32
  }
  func.func @transform_7(%arg0: i32) -> (i32, i32) {
    %c0_i32 = arith.constant 0 : i32
    %c0_i32_0 = arith.constant 0 : i32
    %c0_i32_1 = arith.constant 0 : i32
    return %c0_i32, %c0_i32_0 : i32, i32
  }
  func.func @transform_8(%arg0: i32) -> (i32, i32) {
    %c0_i32 = arith.constant 0 : i32
    %c0_i32_0 = arith.constant 0 : i32
    %c0_i32_1 = arith.constant 0 : i32
    return %c0_i32, %c0_i32_0 : i32, i32
  }
  func.func @transform_9(%arg0: i32) -> (i32, i32) {
    %c0_i32 = arith.constant 0 : i32
    %c0_i32_0 = arith.constant 0 : i32
    %c0_i32_1 = arith.constant 0 : i32
    return %c0_i32, %c0_i32_0 : i32, i32
  }
  func.func @transform_10(%arg0: i32) -> (i32, i32) {
    %c0_i32 = arith.constant 0 : i32
    %c0_i32_0 = arith.constant 0 : i32
    %c0_i32_1 = arith.constant 0 : i32
    return %c0_i32, %c0_i32_0 : i32, i32
  }
  func.func @transform_11(%arg0: i32) -> (i32, i32) {
    %c0_i32 = arith.constant 0 : i32
    %c0_i32_0 = arith.constant 0 : i32
    %c0_i32_1 = arith.constant 0 : i32
    return %c0_i32, %c0_i32_0 : i32, i32
  }
  func.func @transform_12(%arg0: i32) -> (i32, i32) {
    %c0_i32 = arith.constant 0 : i32
    %c0_i32_0 = arith.constant 0 : i32
    %c0_i32_1 = arith.constant 0 : i32
    return %c0_i32, %c0_i32_0 : i32, i32
  }
  func.func @transform_13(%arg0: i32) -> (i32, i32) {
    %c0_i32 = arith.constant 0 : i32
    %c0_i32_0 = arith.constant 0 : i32
    %c0_i32_1 = arith.constant 0 : i32
    return %c0_i32, %c0_i32_0 : i32, i32
  }
  func.func @transform_14(%arg0: i32) -> (i32, i32) {
    %c0_i32 = arith.constant 0 : i32
    %c0_i32_0 = arith.constant 0 : i32
    %c0_i32_1 = arith.constant 0 : i32
    return %c0_i32, %c0_i32_0 : i32, i32
  }
  func.func @transform_15(%arg0: i32) -> (i32, i32) {
    %c0_i32 = arith.constant 0 : i32
    %c0_i32_0 = arith.constant 0 : i32
    %c0_i32_1 = arith.constant 0 : i32
    return %c0_i32, %c0_i32_0 : i32, i32
  }
}

</mosaic_0001>

<bundles_post_ra>
// kernel: tpu_custom_call.1
= control target key start
LH: loop header
LB: loop body
LE: loop exit
PB: predicated region body
PF: predicated region fallthrough
CT: control target
= control target key end

     0   :  { %s2841_s0 = inlined_call_operand.hbm [shape: bf16[8,512], index: 0, kind: input, shape index: {}]   ;;  %s2842_s1 = inlined_call_operand.hbm [shape: bf16[512,128], index: 1, kind: input, shape index: {}]   ;;  %s2843_s2 = inlined_call_operand.hbm [shape: bf16[8,256], index: 2, kind: input, shape index: {}]   ;;  %s2844_s3 = inlined_call_operand.hbm [shape: bf16[8,128], index: 3, kind: input, shape index: {}]   ;;  %s2845_s4 = inlined_call_operand.vmem [shape: f32[1,128], index: 4, kind: input, shape index: {}]   ;;  %s2846_s5 = inlined_call_operand.hbm [shape: bf16[256,128], index: 5, kind: input, shape index: {}]   ;;  %s2847_s6 = inlined_call_operand.vmem [shape: f32[1,128], index: 6, kind: input, shape index: {}]   ;;  %s2848_s7 = inlined_call_operand.hbm [shape: bf16[128,128], index: 7, kind: input, shape index: {}]   ;;  %s2849_s8 = inlined_call_operand.vmem [shape: f32[1,128], index: 8, kind: input, shape index: {}]   ;;  %s2850_s9 = inlined_call_operand.hbm [shape: bf16[128,128], index: 9, kind: input, shape index: {}]   ;;  %s2851_s10 = inlined_call_operand.hbm [shape: bf16[128,128], index: 10, kind: input, shape index: {}]   ;;  %s2852_s11 = inlined_call_operand.hbm [shape: bf16[128,128], index: 11, kind: input, shape index: {}]   ;;  %s2853_s12 = inlined_call_operand.vmem [shape: f32[1,128], index: 12, kind: input, shape index: {}]   ;;  %s2854_s13 = inlined_call_operand.hbm [shape: bf16[128,256], index: 13, kind: input, shape index: {}]   ;;  %s2855_s14 = inlined_call_operand.vmem [shape: f32[1,256], index: 14, kind: input, shape index: {}]   ;;  %s2856_s15 = inlined_call_operand.hbm [shape: f32[8,256], index: 15, kind: output, shape index: {}]  }
   0x1   :  { %2859 = sst [smem:[#allocation29_spill]] %s2843_s2 }
   0x2   :  { %2860 = sst [smem:[#allocation30_spill]] %s2844_s3 }
   0x3   :  { %2861 = sst [smem:[#allocation31_spill]] %s2846_s5 }
   0x4   :  { %2862 = sst [smem:[#allocation32_spill]] %s2848_s7 }
   0x5   :  { %2863 = sst [smem:[#allocation33_spill]] %s2849_s8 }
   0x6   :  { %2864 = sst [smem:[#allocation34_spill]] %s2850_s9 }
   0x7   :  { %2865 = sst [smem:[#allocation35_spill]] %s2851_s10 }
   0x8   :  { %2866 = sst [smem:[#allocation36_spill]] %s2853_s12 }
   0x9   :  { %2867 = sst [smem:[#allocation37_spill]] %s2855_s14 }
   0xa   :  { %2868 = sst [smem:[#allocation38_spill]] %s2856_s15 }
   0xb   :  { %20 = vsyncpa [#allocation4], 0 }
   0xc   :  { %22 = vsyncpa [#allocation4 + $0x1], 0 }
   0xd   :  { %23 = vsyncpa [#allocation7], 0 }
   0xe   :  { %25 = vsyncpa [#allocation7 + $0x1], 0 }
   0xf   :  { %26 = vsyncpa [#allocation10], 0 }
  0x10   :  { %27 = vsyncpa [#allocation13], 0 }
  0x11   :  { %28 = vsyncpa [#allocation16], 0 }
  0x12   :  { %29 = vsyncpa [#allocation19], 0 }
  0x13   :  { %30 = vsyncpa [#allocation5], 0  ;;  %s2598_s18 = smov 0   ;;  %s2600_s19 = smov 0  }
  0x14   :  { %s2602_s20 = smov 0   ;;  %s2604_s21 = smov 0  }
  0x15 LB: > { %s2869_s2 = sld [smem:[#allocation29_spill]]  ;;  %s2622_s25 = sadd.s32 4294967295, %s2502_s21   ;;  %s2502_s21 = sphi %s2604_s21, %s2888_s21   ;;  %s2498_s20 = sphi %s2602_s20, %s2887_s20   ;;  %s2494_s19 = sphi %s2600_s19, %s2886_s19   ;;  %s2490_s18 = sphi %s2598_s18, %s2885_s18  }
  0x16   : > { %p1572_p0 = scmp.ge.s32.totalorder %s2502_s21, 1  ;;  %p57_p1 = scmp.eq.s32.totalorder %s2622_s25, 0 }
  0x17   : > { %p387_p2 = scmp.lt.s32.totalorder %s2502_s21, 5  ;;  %p1573_p3 = scmp.ne.s32.totalorder %s2622_s25, 0 }
  0x18   : > { %s2504_s27 = smov [#allocation8]   ;;  %s2871_s3 = sld [smem:[#allocation30_spill]] }
  0x19   : > { %p2628_p4 = pnand %p1572_p0, %p387_p2  ;;  %s401_s28 = sshll.u32 %s2504_s27, 4  ;;  %s402_s28 = int_to_ptr.vmem [resolvable:$true] %s401_s28 }
  0x1a   : > { %s2505_s22 = smov [#allocation9]   ;;  %s2873_s7 = sld [smem:[#allocation32_spill]] }
  0x1b   : > { %s399_s24 = sshll.u32 %s2869_s2, 4  ;;  %p2005_p5 = pneg %p2628_p4  ;;  %s400_s24 = int_to_ptr.hbm [resolvable:$true] %s399_s24 }
  0x1c   : > { %s413_s23 = sshll.u32 %s2505_s22, 4  ;;  %s2506_s30 = smov [#allocation12]   ;;  %s414_s23 = int_to_ptr.vmem [resolvable:$true] %s413_s23 }
  0x1d   : > { %p2639_p6 = pnand %p2005_p5, %p57_p1  ;;  %s2874_s10 = sld [smem:[#allocation35_spill]] }
  0x1e   : > { %s411_s16 = sshll.u32 %s2871_s3, 4  ;;  %s444_s3 = sshll.u32 %s2506_s30, 4  ;;  %s412_s16 = int_to_ptr.hbm [resolvable:$true] %s411_s16  ;;  %s445_s3 = int_to_ptr.vmem [resolvable:$true] %s444_s3 }
  0x1f   : > { %2008 = dma.hbm_to_vmem [thread:$0]  (!%p2639_p6), %s400_s24, 128, %s402_s28, [#allocation7]  }
  0x20   : > { %2011 = dma.hbm_to_vmem [thread:$0]  (!%p2639_p6), %s412_s16, 64, %s414_s23, [#allocation10]  }
  0x21   : > { %s442_s29 = sshll.u32 %s2873_s7, 4  ;;  %s2857_s22 = smov 64   ;;  %s443_s29 = int_to_ptr.hbm [resolvable:$true] %s442_s29 }
  0x22   : > { %s2858_s8 = smov 4   ;;  %s2509_s2 = smov [#allocation15]  }
  0x23   : > { %s473_s12 = sshll.u32 %s2874_s10, 4  ;;  %s475_s24 = sshll.u32 %s2509_s2, 4  ;;  %s474_s12 = int_to_ptr.hbm [resolvable:$true] %s473_s12  ;;  %s476_s24 = int_to_ptr.vmem [resolvable:$true] %s475_s24 }
  0x24   : > { %2017 = dma.hbm_to_vmem [thread:$0]  (!%p2639_p6), %s443_s29, 1024, %s445_s3, [#allocation13], %s2857_s22, %s2857_s22, %s2858_s8  }
  0x25   : > { %s2875_s5 = sld [smem:[#allocation31_spill]]  ;;  %s2510_s3 = smov [#allocation11]  }
  0x26   : > { %2023 = dma.hbm_to_vmem [thread:$0]  (!%p2639_p6), %s474_s12, 1024, %s476_s24, [#allocation16], %s2857_s22, %s2857_s22, %s2858_s8  }
  0x27   : > { %s2876_s9 = sld [smem:[#allocation34_spill]]  ;;  %s427_s29 = sshll.u32 %s2510_s3, 4  ;;  %s428_s29 = int_to_ptr.vmem [resolvable:$true] %s427_s29 }
  0x28   : > { %s2511_s30 = smov [#allocation14]   ;;  %s487_s12 = sshll.u32 %s2852_s11, 4  ;;  %s488_s12 = int_to_ptr.hbm [resolvable:$true] %s487_s12 }
  0x29   : > { %s461_s2 = sshll.u32 %s2511_s30, 4  ;;  %s2512_s15 = smov [#allocation17]   ;;  %s462_s2 = int_to_ptr.vmem [resolvable:$true] %s461_s2 }
  0x2a   : > { %s489_s3 = sshll.u32 %s2512_s15, 4  ;;  %s2514_s30 = smov 128   ;;  %s490_s3 = int_to_ptr.vmem [resolvable:$true] %s489_s3 }
  0x2b   : > { %s425_s23 = sshll.u32 %s2875_s5, 4  ;;  %s2693_s28 = sadd.s32 1, %s2502_s21   ;;  %s426_s23 = int_to_ptr.hbm [resolvable:$true] %s425_s23 }
  0x2c   : > { %2014 = dma.hbm_to_vmem [thread:$0]  (!%p2639_p6), %s426_s23, 2048, %s428_s29, [#allocation10], %s2857_s22, %s2857_s22, %s2858_s8  }
  0x2d   : > { %s459_s27 = sshll.u32 %s2876_s9, 4  ;;  %s504_s23 = sshll.u32 %s2854_s13, 4  ;;  %s460_s27 = int_to_ptr.hbm [resolvable:$true] %s459_s27  ;;  %s505_s23 = int_to_ptr.hbm [resolvable:$true] %s504_s23 }
  0x2e   : > { %2020 = dma.hbm_to_vmem [thread:$0]  (!%p2639_p6), %s460_s27, 1024, %s462_s2, [#allocation13], %s2857_s22, %s2857_s22, %s2858_s8  }
  0x2f   : > { %2026 = dma.hbm_to_vmem [thread:$0]  (!%p2639_p6), %s488_s12, 1024, %s490_s3, [#allocation16], %s2857_s22, %s2857_s22, %s2858_s8  }
  0x30   : > { %s2513_s27 = smov [#allocation18]   ;;  %s2515_s2 = smov 8  }
  0x31   : > { %s506_s29 = sshll.u32 %s2513_s27, 4  ;;  %s43_s16 = sadd.s32 1, %s2498_s20  ;;  %s507_s29 = int_to_ptr.vmem [resolvable:$true] %s506_s29 }
  0x32   : > { %2029 = dma.hbm_to_vmem [thread:$0]  (!%p2639_p6), %s505_s23, 2048, %s507_s29, [#allocation19], %s2514_s30, %s2514_s30, %s2515_s2  }
  0x33   : > { %s40_s24 = ssub.s32 %s2502_s21, %s2693_s28  ;;  %p50_p7 = scmp.ne.s32.totalorder %s2498_s20, %s2494_s19 }
  0x34   : > { %p41_p8 = scmp.eq.s32.totalorder %s40_s24, 0  ;;  %p51_p9 = scmp.eq.s32.totalorder %s2502_s21, 0 }
  0x35   : > { %p56_p10 = scmp.ne.s32.totalorder %s2494_s19, %s2490_s18  ;;  %p2045_p11 = scmp.lt.s32.totalorder %s2502_s21, 4 }
  0x36   : > { %s2705_s12 = scalar_select %p41_p8, %s2498_s20, %s43_s16  }
  0x37   : > { %p52_p12 = por %p51_p9, %p50_p7  ;;  %p2709_p13 = por %p57_p1, %p56_p10 }
  0x38   : > { %s2714_s17 = sand.u32 1, %s2498_s20   ;;  %s1583_s23 = sshll.u32 %s2502_s21, 2 }
  0x39   : > { %s1582_s15 = sshll.u32 %s2714_s17, 2  ;;  %s531_s18 = scalar_lea.hbm %s2841_s0, %s1583_s23 }
  0x3a   : > { %s533_s29 = sshll.u32 %s531_s18, 4  ;;  %s527_s30 = scalar_lea.vmem [#allocation3], %s1582_s15  ;;  %s534_s29 = int_to_ptr.hbm [resolvable:$true] %s533_s29 }
  0x3b   : > { %s535_s2 = sshll.u32 %s527_s30, 4  ;;  %p2723_p0 = pnand %p2045_p11, %p52_p12  ;;  %s536_s2 = int_to_ptr.vmem [resolvable:$true] %s535_s2 }
  0x3c   : > { %s1584_s24 = sshll.u32 %s2714_s17, 6  ;;  %s542_s22 = sand.u32 1, %s2502_s21  }
  0x3d   : > { %s546_s8 = scalar_lea.vmem [#allocation6], %s1584_s24  ;;  %s524_s7 = scalar_lea.sflag [#allocation4], %s2714_s17 }
  0x3e   : > { %s554_s5 = sshll.u32 %s546_s8, 4  ;;  %s2352_s9 = sshra.s32 %s534_s29, 4  ;;  %s2353_s9 = int_to_ptr.hbm [resolvable:$true] %s2352_s9  ;;  %s555_s5 = int_to_ptr.vmem [resolvable:$true] %s554_s5 }
  0x3f   : > { %s2354_s23 = scalar_lea.hbm %s2353_s9, 4  ;;  %p2356_p5 = pneg %p2723_p0 }
  0x40   : > { %p2355_p2 = scmp.ne.s32.totalorder %s2353_s9, %s2354_s23  ;;  %s2359_s27 = scalar_lea.hbm %s2841_s0, 16 }
  0x41   : > { %p2360_p8 = scmp.lt.s32.totalorder %s2353_s9, %s2841_s0  ;;  %p2361_p9 = scmp.lt.s32.totalorder %s2359_s27, %s2354_s23 }
  0x42   : > { %p2357_p6 = pnand %p2356_p5, %p2355_p2 }
  0x43   : > { %p2362_p10 = por %p2361_p9, %p2360_p8 }
  0x44   : > { %p2358_p7 = pneg %p2357_p6 }
  0x46   : > { %p2363_p11 = pnand %p2362_p10, %p2358_p7 }
  0x48   : > { %2366 = shalt.err (!%p2363_p11)
}
  0x49   : > { %2033 = dma.hbm_to_vmem [thread:$0]  (!%p2723_p0), %s534_s29, 64, %s536_s2, %s524_s7  }
  0x4a   : > { %s1892_s8 = sshll.u32 %s2502_s21, 6  ;;  %s543_s10 = scalar_lea.sflag [#allocation7], %s542_s22 }
  0x4b   : > { %s551_s15 = scalar_lea.hbm %s2842_s1, %s1892_s8  ;;  %s2389_s7 = scalar_lea.hbm %s2842_s1, 256 }
  0x4c   : > { %s552_s3 = sshll.u32 %s551_s15, 4  ;;  %s553_s3 = int_to_ptr.hbm [resolvable:$true] %s552_s3 }
  0x4d   : > { %s2382_s18 = sshra.s32 %s553_s3, 4  ;;  %s2383_s18 = int_to_ptr.hbm [resolvable:$true] %s2382_s18 }
  0x4e   : > { %s2384_s9 = scalar_lea.hbm %s2383_s18, 64  ;;  %p2390_p7 = scmp.lt.s32.totalorder %s2383_s18, %s2842_s1 }
  0x4f   : > { %p2385_p12 = scmp.ne.s32.totalorder %s2383_s18, %s2384_s9  ;;  %p2391_p8 = scmp.lt.s32.totalorder %s2389_s7, %s2384_s9 }
  0x51   : > { %p2387_p2 = pnand %p2385_p12, %p2356_p5  ;;  %p2392_p9 = por %p2391_p8, %p2390_p7 }
  0x53   : > { %p2388_p6 = pneg %p2387_p2 }
  0x55   : > { %p2393_p10 = pnand %p2392_p9, %p2388_p6 }
  0x57   : > { %2396 = shalt.err (!%p2393_p10)
}
  0x58   : > { %s2879_s22 = smov 4   ;;  %s2880_s2 = smov 64  }
  0x59   : > { %2036 = dma.hbm_to_vmem [thread:$0]  (!%p2723_p0), %s553_s3, 1024, %s555_s5, %s543_s10, %s2880_s2, %s2880_s2, %s2879_s22  }
  0x5a   : > { %566 = sbr.rel (%p2628_p4) target bundleno = 996 (0x3e4), region = 80  ;;  %s568_s30 = sand.u32 (!%p2628_p4), 1, %s2494_s19  }
  0x5b   : > { %s1588_s8 = sshll.u32 (!%p2628_p4), %s568_s30, 2  ;;  %s569_s17 = scalar_lea.sflag (!%p2628_p4), [#allocation4], %s568_s30 }
  0x5c   : > { %s2764_s24 = scalar_lea.vmem (!%p2628_p4), [#allocation3], %s1588_s8 }
  0x5f   : > { %2457 = dma.done.wait (%p2709_p13), %s569_s17, 64  }
  0x60   : > { %2459 = vsyncadd (%p2709_p13), %s569_s17, 4294967232  ;;  %s578_s16 = sand.u32 1, %s2622_s25   ;;  %s1589_s15 = sshll.u32 %s568_s30, 6 }
  0x61   : > { %s579_s5 = scalar_lea.sflag [#allocation7], %s578_s16  ;;  %s2771_s10 = scalar_lea.vmem [#allocation6], %s1589_s15 }
  0x62   : > { %2461 = dma.done.wait (%p2709_p13), %s579_s5, 1024  }
  0x63   : > { %2463 = vsyncadd (%p2709_p13), %s579_s5, 4294966272 }
  0x64   : > { %2465 = dma.done.wait (%p57_p1), [#allocation7], 128  }
  0x65   : > { %2467 = vsyncadd (%p57_p1), [#allocation7], 4294967168 }
  0x66   : > { %2469 = dma.done.wait (%p57_p1), [#allocation10], 2112  }
  0x67   : > { %2471 = vsyncadd (%p57_p1), [#allocation10], 4294965184 }
  0x68   : > { %2473 = dma.done.wait (%p57_p1), [#allocation13], 2048  }
  0x69   : > { %2475 = vsyncadd (%p57_p1), [#allocation13], 4294965248 }
  0x6a   : > { %2477 = dma.done.wait (%p57_p1), [#allocation16], 2048  }
  0x6b   : > { %2479 = vsyncadd (%p57_p1), [#allocation16], 4294965248 }
  0x6c   : > { %2481 = dma.done.wait (%p57_p1), [#allocation19], 2048  }
  0x6d   : > { %2483 = vsyncadd (%p57_p1), [#allocation19], 4294965248  ;;  %674 = sbr.rel (%p1573_p3) target bundleno = 116 (0x74), region = 124 }
  0x72   : > { %v2516_v0 = vmov 0.0  }
  0x73   : > { %675 = vst [vmem:[#allocation2] sm:$0xff] %v2516_v0 }
  0x74 PF: > { %v1900_v1 = vld [vmem:[%s2771_s10 + $0x38] sm:$0xff]  ;;  %v1899_v2 = vld [vmem:[%s2771_s10 + $0x30] sm:$0xff]  ;;  %v1898_v3 = vld [vmem:[%s2771_s10 + $0x28] sm:$0xff]  ;;  %p1631_p1 = scmp.ne.s32.totalorder %s2622_s25, 3 }
  0x75   : > { %742 = vmatpush.bf16.msra.mxu0 %v1900_v1  ;;  %v1897_v4 = vld [vmem:[%s2771_s10 + $0x20] sm:$0xff]  ;;  %v1896_v5 = vld [vmem:[%s2771_s10 + $0x18] sm:$0xff]  ;;  %v1895_v6 = vld [vmem:[%s2771_s10 + $0x10] sm:$0xff]  ;;  %s2881_s27 = sld [smem:[#allocation33_spill]] (!%p1631_p1) }
  0x76   : > { %v1894_v7 = vld [vmem:[%s2771_s10 + $0x8] sm:$0xff]  ;;  %v1893_v8 = vld [vmem:[%s2771_s10] sm:$0xff]  ;;  %v677_v9 = vld [vmem:[%s2764_s24] sm:$0xf]  ;;  %s2882_s29 = sld [smem:[#allocation36_spill]] (!%p1631_p1) }
  0x77   : > { %s2883_s30 = sld [smem:[#allocation37_spill]] (!%p1631_p1) }
  0x79   : > { %743 = vmatpush.bf16.msra.mxu0 %v1899_v2 }
  0x7a   : > { %v676_v10 = vld [vmem:[#allocation2] sm:$0xff] }
  0x7d   : > { %744 = vmatpush.bf16.msra.mxu0 %v1898_v3 }
  0x81   : > { %745 = vmatpush.bf16.msra.mxu0 %v1897_v4 }
  0x85   : > { %746 = vmatpush.bf16.msra.mxu0 %v1896_v5 }
  0x89   : > { %747 = vmatpush.bf16.msra.mxu0 %v1895_v6 }
  0x8d   : > { %748 = vmatpush.bf16.msra.mxu0 %v1894_v7 }
  0x91   : > { %749 = vmatpush.bf16.msra.mxu0 %v1893_v8 }
  0x94   : > { %750 = vmatmul.bf16.vlgmr.msra.gmra.mxu0 %v677_v9 }
 0x111   : > { %v751_v11 = vpop.f32.mrf.mxu0 }
 0x112   : > { %v755_v12 = vadd.f32 %v751_v11, %v676_v10 }
 0x114   : > { %756 = vst [vmem:[#allocation2] sm:$0xff] %v755_v12 }
 0x115   : > { %760 = sbr.rel (%p1631_p1) target bundleno = 985 (0x3d9), region = 128 }
 0x119   : > { %v753_v13 = vpop.f32.mrf.mxu0 }
 0x11a   : > { %v1908_v14 = vld [vmem:[#allocation11 + $0x38] sm:$0xff]  ;;  %v1907_v17 = vld [vmem:[#allocation11 + $0x30] sm:$0xff]  ;;  %v1906_v20 = vld [vmem:[#allocation11 + $0x28] sm:$0xff] }
 0x11b   : > { %v1916_v15 = vld [vmem:[#allocation11 + $0x78] sm:$0xff]  ;;  %910 = vmatpush.bf16.msra.mxu0 %v1908_v14  ;;  %v1915_v18 = vld [vmem:[#allocation11 + $0x70] sm:$0xff]  ;;  %v1914_v21 = vld [vmem:[#allocation11 + $0x68] sm:$0xff] }
 0x11c   : > { %v1924_v16 = vld [vmem:[#allocation12 + $0x38] sm:$0xff]  ;;  %923 = vmatpush.bf16.msra.mxu1 %v1916_v15  ;;  %v1923_v19 = vld [vmem:[#allocation12 + $0x30] sm:$0xff]  ;;  %v1922_v22 = vld [vmem:[#allocation12 + $0x28] sm:$0xff] }
 0x11d   : > { %1008 = vmatpush.bf16.msra.mxu2 %v1924_v16  ;;  %v1940_v23 = vld [vmem:[#allocation15 + $0x38] sm:$0xff]  ;;  %v1905_v24 = vld [vmem:[#allocation11 + $0x20] sm:$0xff]  ;;  %v1939_v27 = vld [vmem:[#allocation15 + $0x30] sm:$0xff] }
 0x11e   : > { %v1913_v25 = vld [vmem:[#allocation11 + $0x60] sm:$0xff]  ;;  %1106 = vmatpush.bf16.msra.mxu3 %v1940_v23  ;;  %v1904_v28 = vld [vmem:[#allocation11 + $0x18] sm:$0xff]  ;;  %v1938_v31 = vld [vmem:[#allocation15 + $0x28] sm:$0xff] }
 0x11f   : > { %911 = vmatpush.bf16.msra.mxu0 %v1907_v17  ;;  %v1921_v26 = vld [vmem:[#allocation12 + $0x20] sm:$0xff]  ;;  %v1912_v29 = vld [vmem:[#allocation11 + $0x58] sm:$0xff]  ;;  %v1903_v32 = vld [vmem:[#allocation11 + $0x10] sm:$0xff] }
 0x120   : > { %924 = vmatpush.bf16.msra.mxu1 %v1915_v18  ;;  %v1920_v30 = vld [vmem:[#allocation12 + $0x18] sm:$0xff]  ;;  %v1911_v33 = vld [vmem:[#allocation11 + $0x50] sm:$0xff]  ;;  %v1937_v35 = vld [vmem:[#allocation15 + $0x20] sm:$0xff] }
 0x121   : > { %1009 = vmatpush.bf16.msra.mxu2 %v1923_v19  ;;  %v1919_v34 = vld [vmem:[#allocation12 + $0x10] sm:$0xff]  ;;  %v1902_v36 = vld [vmem:[#allocation11 + $0x8] sm:$0xff]  ;;  %v1936_v40 = vld [vmem:[#allocation15 + $0x18] sm:$0xff] }
 0x122   : > { %1107 = vmatpush.bf16.msra.mxu3 %v1939_v27  ;;  %v1910_v37 = vld [vmem:[#allocation11 + $0x48] sm:$0xff]  ;;  %v770_v38 = vld [vmem:[#allocation8] sm:$0xff]  ;;  %v1901_v43 = vld [vmem:[#allocation11] sm:$0xff] }
 0x123   : > { %912 = vmatpush.bf16.msra.mxu0 %v1906_v20  ;;  %v1918_v39 = vld [vmem:[#allocation12 + $0x8] sm:$0xff]  ;;  %v808_v41 = vunpack.c.l.b16 %v770_v38  ;;  %v809_v42 = vunpack.c.h.b16 %v770_v38  ;;  %v1909_v44 = vld [vmem:[#allocation11 + $0x40] sm:$0xff]  ;;  %v1932_v46 = vld [vmem:[#allocation14 + $0x38] sm:$0xff] }
 0x124   : > { %925 = vmatpush.bf16.msra.mxu1 %v1914_v21  ;;  %v1917_v45 = vld [vmem:[#allocation12] sm:$0xff]  ;;  %v1948_v47 = vld [vmem:[#allocation17 + $0x38] sm:$0xff]  ;;  %v1935_v48 = vld [vmem:[#allocation15 + $0x10] sm:$0xff] }
 0x125   : > { %1010 = vmatpush.bf16.msra.mxu2 %v1922_v22  ;;  %v810_v49 = vpack.c.b16 %v808_v41, %v808_v41  ;;  %v811_v50 = vpack.c.b16 %v809_v42, %v809_v42  ;;  %v939_v51 = vld [vmem:[#allocation9] sm:$0xf]  ;;  %v1931_v52 = vld [vmem:[#allocation14 + $0x30] sm:$0xff]  ;;  %v1930_v54 = vld [vmem:[#allocation14 + $0x28] sm:$0xff] }
 0x126   : > { %1108 = vmatpush.bf16.msra.mxu3 %v1938_v31  ;;  %v1947_v53 = vld [vmem:[#allocation17 + $0x30] sm:$0xff]  ;;  %v1946_v55 = vld [vmem:[#allocation17 + $0x28] sm:$0xff]  ;;  %v1929_v56 = vld [vmem:[#allocation14 + $0x20] sm:$0xff] }
 0x127   : > { %913 = vmatpush.bf16.msra.mxu0 %v1905_v24  ;;  %v1945_v57 = vld [vmem:[#allocation17 + $0x20] sm:$0xff]  ;;  %v1928_v58 = vld [vmem:[#allocation14 + $0x18] sm:$0xff]  ;;  %v1927_v60 = vld [vmem:[#allocation14 + $0x10] sm:$0xff] }
 0x128   : > { %926 = vmatpush.bf16.msra.mxu1 %v1913_v25  ;;  %v1944_v59 = vld [vmem:[#allocation17 + $0x18] sm:$0xff]  ;;  %v1926_v61 = vld [vmem:[#allocation14 + $0x8] sm:$0xff]  ;;  %v2104_v62 = vld [vmem:[%s2845_s4] ss:$0 sm:$0xff] }
 0x129   : > { %1011 = vmatpush.bf16.msra.mxu2 %v1921_v26  ;;  %v761_v63 = vld [vmem:[#allocation2] sm:$0xff]  ;;  %v1943_v1 = vld [vmem:[#allocation17 + $0x10] sm:$0xff]  ;;  %v1964_v11 = vld [vmem:[#allocation18 + $0x74] sm:$0xf0] }
 0x12a   : > { %1109 = vmatpush.bf16.msra.mxu3 %v1937_v35  ;;  %v1934_v0 = vld [vmem:[#allocation15 + $0x8] sm:$0xff]  ;;  %v766_v2 = vadd.f32 %v2104_v62, %v761_v63  ;;  %v1925_v3 = vld [vmem:[#allocation14] sm:$0xff]  ;;  %v1882_v10 = vld [vmem:[#allocation18 + $0x70] sm:$0xf] }
 0x12b   : > { %914 = vmatpush.bf16.msra.mxu0 %v1904_v28  ;;  %v1933_v5 = vld [vmem:[#allocation15] sm:$0xff]  ;;  %v1942_v6 = vld [vmem:[#allocation17 + $0x8] sm:$0xff]  ;;  %v1963_v12 = vld [vmem:[#allocation18 + $0x74] sm:$0xf]  ;;  %v1883_v13 = vor.u32 %v1964_v11, %v1882_v10 }
 0x12c   : > { %927 = vmatpush.bf16.msra.mxu1 %v1912_v29  ;;  %v768_v4 = vmul.f32 0.1, %v766_v2  ;;  %vm767_vm0 = vcmp.gt.f32.partialorder %v766_v2, 0.0  ;;  %v1941_v9 = vld [vmem:[#allocation17] sm:$0xff]  ;;  %v1884_v14 = vld [vmem:[#allocation18 + $0x78] sm:$0xf0] }
 0x12d   : > { %1012 = vmatpush.bf16.msra.mxu2 %v1920_v30  ;;  %v1874_v15 = vld [vmem:[#allocation18 + $0x60] sm:$0xf]  ;;  %v1962_v16 = vld [vmem:[#allocation18 + $0x64] sm:$0xf0]  ;;  %v1887_v17 = vor.u32 %v1963_v12, %v1884_v14  ;;  %v1961_v18 = vld [vmem:[#allocation18 + $0x64] sm:$0xf] }
 0x12e   : > { %1110 = vmatpush.bf16.msra.mxu3 %v1936_v40  ;;  %v769_v7 = vsel %vm767_vm0, %v766_v2, %v768_v4  ;;  %v1876_v19 = vld [vmem:[#allocation18 + $0x68] sm:$0xf0]  ;;  %v1875_v20 = vor.u32 %v1962_v16, %v1874_v15  ;;  %v1866_v22 = vld [vmem:[#allocation18 + $0x50] sm:$0xf]  ;;  %v1960_v23 = vld [vmem:[#allocation18 + $0x54] sm:$0xf0] }
 0x12f   : > { %915 = vmatpush.bf16.msra.mxu0 %v1903_v32  ;;  %v1024_v8 = vpack.c.bf16 %v769_v7, %v769_v7  ;;  %v1879_v21 = vor.u32 %v1961_v18, %v1876_v19  ;;  %v1959_v24 = vld [vmem:[#allocation18 + $0x54] sm:$0xf]  ;;  %v1868_v25 = vld [vmem:[#allocation18 + $0x58] sm:$0xf0]  ;;  %v1867_v26 = vor.u32 %v1960_v23, %v1866_v22  ;;  %v2102_v28 = vld [vmem:[%s2847_s6] ss:$0 sm:$0xff] }
 0x130   : > { %928 = vmatpush.bf16.msra.mxu1 %v1911_v33  ;;  %v1871_v27 = vor.u32 %v1959_v24, %v1868_v25  ;;  %v2103_v33 = vld [vmem:[%s2881_s27] ss:$0 sm:$0xff]  ;;  %v1844_v62 = vld [vmem:[#allocation18 + $0x28] sm:$0xf0]  ;;  %v1952_v2 = vld [vmem:[#allocation18 + $0x14] sm:$0xf0] }
 0x131   : > { %1013 = vmatpush.bf16.msra.mxu2 %v1919_v34  ;;  %v1951_v4 = vld [vmem:[#allocation18 + $0x14] sm:$0xf]  ;;  %v1826_v7 = vld [vmem:[#allocation18] sm:$0xf]  ;;  %v1828_v11 = vld [vmem:[#allocation18 + $0x8] sm:$0xf0] }
 0x132   : > { %1111 = vmatpush.bf16.msra.mxu3 %v1935_v48  ;;  %v2105_v16 = vld [vmem:[%s2882_s29] ss:$0 sm:$0xff] }
 0x133   : > { %916 = vmatpush.bf16.msra.mxu0 %v1902_v36  ;;  %v1284_v24 = vld [vmem:[%s2883_s30] sm:$0x3] }
 0x134   : > { %929 = vmatpush.bf16.msra.mxu1 %v1910_v37  ;;  %v1286_v25 = vperm.slane %v1284_v24, 0 }
 0x135   : > { %1014 = vmatpush.bf16.msra.mxu2 %v1918_v39 }
 0x136   : > { %1112 = vmatpush.bf16.msra.mxu3 %v1934_v0 }
 0x137   : > { %917 = vmatpush.bf16.msra.mxu0 %v1901_v43 }
 0x138   : > { %930 = vmatpush.bf16.msra.mxu1 %v1909_v44 }
 0x139   : > { %1015 = vmatpush.bf16.msra.mxu2 %v1917_v45  ;;  %v1858_v45 = vld [vmem:[#allocation18 + $0x40] sm:$0xf] }
 0x13a   : > { %918 = vmatmul.bf16.vlgmr.msra.gmra.mxu0 %v810_v49  ;;  %1113 = vmatpush.bf16.msra.mxu3 %v1933_v5  ;;  %v1860_v49 = vld [vmem:[#allocation18 + $0x48] sm:$0xf0]  ;;  %v1836_v5 = vld [vmem:[#allocation18 + $0x18] sm:$0xf0] }
 0x13b   : > { %1167 = vmatpush.bf16.msrb.mxu0 %v1932_v46  ;;  %931 = vmatmul.bf16.vlgmr.msra.gmra.mxu1 %v811_v50  ;;  %v1958_v46 = vld [vmem:[#allocation18 + $0x44] sm:$0xf0]  ;;  %v1850_v50 = vld [vmem:[#allocation18 + $0x30] sm:$0xf] }
 0x13c   : > { %1245 = vmatpush.bf16.msrb.mxu1 %v1948_v47  ;;  %1016 = vmatmul.bf16.vlgmr.msra.gmra.mxu2 %v939_v51  ;;  %v1957_v47 = vld [vmem:[#allocation18 + $0x44] sm:$0xf]  ;;  %v1859_v48 = vor.u32 %v1958_v46, %v1858_v45  ;;  %v1956_v51 = vld [vmem:[#allocation18 + $0x34] sm:$0xf0] }
 0x13d   : > { %1370 = vmatpush.bf16.msrb.mxu2 %v1883_v13 }
 0x13e   : > { %1383 = vmatpush.bf16.msrb.mxu3 %v1887_v17 }
 0x13f   : > { %1168 = vmatpush.bf16.msrb.mxu0 %v1931_v52  ;;  %v1863_v52 = vor.u32 %v1957_v47, %v1860_v49 }
 0x140   : > { %1246 = vmatpush.bf16.msrb.mxu1 %v1947_v53  ;;  %v1955_v53 = vld [vmem:[#allocation18 + $0x34] sm:$0xf] }
 0x141   : > { %1371 = vmatpush.bf16.msrb.mxu2 %v1875_v20 }
 0x142   : > { %1384 = vmatpush.bf16.msrb.mxu3 %v1879_v21 }
 0x143   : > { %1169 = vmatpush.bf16.msrb.mxu0 %v1930_v54  ;;  %v1852_v54 = vld [vmem:[#allocation18 + $0x38] sm:$0xf0] }
 0x144   : > { %1247 = vmatpush.bf16.msrb.mxu1 %v1946_v55  ;;  %v1851_v55 = vor.u32 %v1956_v51, %v1850_v50 }
 0x145   : > { %1372 = vmatpush.bf16.msrb.mxu2 %v1867_v26  ;;  %v1287_v26 = vperm.slane %v1284_v24, 1 }
 0x146   : > { %1385 = vmatpush.bf16.msrb.mxu3 %v1871_v27 }
 0x147   : > { %1170 = vmatpush.bf16.msrb.mxu0 %v1929_v56  ;;  %v1855_v56 = vor.u32 %v1955_v53, %v1852_v54 }
 0x148   : > { %1248 = vmatpush.bf16.msrb.mxu1 %v1945_v57 }
 0x149   : > { %1373 = vmatpush.bf16.msrb.mxu2 %v1859_v48 }
 0x14a   : > { %1386 = vmatpush.bf16.msrb.mxu3 %v1863_v52 }
 0x14b   : > { %1171 = vmatpush.bf16.msrb.mxu0 %v1928_v58  ;;  %v1842_v58 = vld [vmem:[#allocation18 + $0x20] sm:$0xf] }
 0x14c   : > { %1249 = vmatpush.bf16.msrb.mxu1 %v1944_v59  ;;  %v1954_v59 = vld [vmem:[#allocation18 + $0x24] sm:$0xf0] }
 0x14d   : > { %1374 = vmatpush.bf16.msrb.mxu2 %v1851_v55 }
 0x14e   : > { %1387 = vmatpush.bf16.msrb.mxu3 %v1855_v56 }
 0x14f   : > { %1172 = vmatpush.bf16.msrb.mxu0 %v1927_v60  ;;  %v1953_v60 = vld [vmem:[#allocation18 + $0x24] sm:$0xf] }
 0x150   : > { %1250 = vmatpush.bf16.msrb.mxu1 %v1943_v1  ;;  %v1847_v0 = vor.u32 %v1953_v60, %v1844_v62  ;;  %v1834_v1 = vld [vmem:[#allocation18 + $0x10] sm:$0xf] }
 0x152   : > { %1388 = vmatpush.bf16.msrb.mxu3 %v1847_v0 }
 0x153   : > { %1173 = vmatpush.bf16.msrb.mxu0 %v1926_v61  ;;  %v1843_v61 = vor.u32 %v1954_v59, %v1842_v58 }
 0x154   : > { %1251 = vmatpush.bf16.msrb.mxu1 %v1942_v6  ;;  %v1839_v6 = vor.u32 %v1951_v4, %v1836_v5 }
 0x155   : > { %1375 = vmatpush.bf16.msrb.mxu2 %v1843_v61 }
 0x156   : > { %1389 = vmatpush.bf16.msrb.mxu3 %v1839_v6 }
 0x157   : > { %1174 = vmatpush.bf16.msrb.mxu0 %v1925_v3  ;;  %v1835_v3 = vor.u32 %v1952_v2, %v1834_v1 }
 0x158   : > { %1252 = vmatpush.bf16.msrb.mxu1 %v1941_v9  ;;  %v1949_v9 = vld [vmem:[#allocation18 + $0x4] sm:$0xf] }
 0x159   : > { %1376 = vmatpush.bf16.msrb.mxu2 %v1835_v3  ;;  %v1831_v12 = vor.u32 %v1949_v9, %v1828_v11 }
 0x15a   : > { %1175 = vmatmul.bf16.vlgmr.msrb.gmra.mxu0 %v1024_v8  ;;  %v1950_v8 = vld [vmem:[#allocation18 + $0x4] sm:$0xf0] }
 0x15b   : > { %v1827_v10 = vor.u32 %v1950_v8, %v1826_v7  ;;  %1390 = vmatpush.bf16.msrb.mxu3 %v1831_v12 }
 0x15d   : > { %1377 = vmatpush.bf16.msrb.mxu2 %v1827_v10 }
 0x1b7   : > { %v919_v29 = vpop.f32.mrf.mxu0 }
 0x1b8   : > { %v932_v30 = vpop.f32.mrf.mxu1  ;;  %v920_v31 = vadd.f32 %v2102_v28, %v919_v29 }
 0x1ba   : > { %v933_v32 = vadd.f32 %v932_v30, %v920_v31 }
 0x1bc   : > { %v937_v34 = vmul.f32 0.1, %v933_v32  ;;  %vm936_vm1 = vcmp.gt.f32.partialorder %v933_v32, 0.0 }
 0x1be   : > { %v938_v36 = vsel %vm936_vm1, %v933_v32, %v937_v34 }
 0x1bf   : > { %v1017_v35 = vpop.f32.mrf.mxu2  ;;  %v921_v38 = vpop.f32.mrf.mxu0  ;;  %v1041_v40 = vpack.c.bf16 %v938_v36, %v938_v36 }
 0x1c0   : > { %v1018_v37 = vadd.f32 %v2103_v33, %v1017_v35  ;;  %v934_v39 = vpop.f32.mrf.mxu1 }
 0x1c1   : > { %1114 = vmatmul.bf16.vlgmr.msra.gmra.mxu3 %v1041_v40 }
 0x1c2   : > { %vm1021_vm2 = vcmp.gt.f32.partialorder %v1018_v37, 0.0  ;;  %v1022_v41 = vmul.f32 0.1, %v1018_v37 }
 0x1c4   : > { %v1023_v42 = vsel %vm1021_vm2, %v1018_v37, %v1022_v41 }
 0x1c5   : > { %v1180_v43 = vpack.c.bf16 %v1023_v42, %v1023_v42 }
 0x1c7   : > { %v1019_v44 = vpop.f32.mrf.mxu2  ;;  %1253 = vmatmul.bf16.vlgmr.msrb.gmra.mxu1 %v1180_v43 }
 0x1d7   : > { %v1176_v57 = vpop.f32.mrf.mxu0 }
 0x1df   : > { %v1178_v63 = vpop.f32.mrf.mxu0 }
 0x244   : > { %v1254_v13 = vpop.f32.mrf.mxu1  ;;  %v1115_v14 = vpop.f32.mrf.mxu3 }
 0x245   : > { %v1177_v15 = vadd.f32 %v1176_v57, %v1115_v14 }
 0x247   : > { %v1258_v17 = vadd.f32 %v1254_v13, %v1177_v15 }
 0x249   : > { %v1263_v18 = vadd.f32 %v2105_v16, %v1258_v17 }
 0x24b   : > { %vm1264_vm3 = vcmp.gt.f32.partialorder %v1263_v18, 0.0  ;;  %v1265_v20 = vmul.f32 0.1, %v1263_v18 }
 0x24c   : > { %v1256_v19 = vpop.f32.mrf.mxu1  ;;  %v1117_v21 = vpop.f32.mrf.mxu3 }
 0x24d   : > { %v1266_v22 = vsel %vm1264_vm3, %v1263_v18, %v1265_v20 }
 0x24e   : > { %v1267_v23 = vpack.c.bf16 %v1266_v22, %v1266_v22 }
 0x250   : > { %1378 = vmatmul.bf16.vlgmr.msrb.gmra.mxu2 %v1267_v23  ;;  %1391 = vmatmul.bf16.vlgmr.msrb.gmra.mxu3 %v1267_v23 }
 0x2d3   : > { %v1379_v27 = vpop.f32.mrf.mxu2  ;;  %v1392_v28 = vpop.f32.mrf.mxu3 }
 0x2d4   : > { %v1380_v29 = vadd.f32 %v1379_v27, %v1286_v25  ;;  %v1393_v30 = vadd.f32 %v1392_v28, %v1287_v26 }
 0x2d6   : > { %v1396_v31 = vmax.f32 %v1380_v29, %v1393_v30 }
 0x2d8   : > { %1397 = vmax.xlane.f32.xlu0 %v1396_v31 }
 0x2db   : > { %v1381_v32 = vpop.f32.mrf.mxu2  ;;  %v1394_v33 = vpop.f32.mrf.mxu3 }
 0x34b   : > { %v1398_v34 = vpop.xlane.xlu0 %1397 }
 0x34c   : > { %v1399_v35 = vsub.f32 %v1380_v29, %v1398_v34  ;;  %v1400_v36 = vsub.f32 %v1393_v30, %v1398_v34 }
 0x34e   : > { %v1401_v37 = vmul.f32 1.442695, %v1399_v35  ;;  %v1403_v38 = vmul.f32 1.442695, %v1400_v36 }
 0x350   : > { %2106 = vpow2.f32 %v1401_v37 }
 0x351   : > { %2108 = vpow2.f32 %v1403_v38 }
 0x356   : > { %v2107_v39 = vpop.eup %2106 }
 0x357   : > { %v2109_v40 = vpop.eup %2108 }
 0x358   : > { %v1405_v41 = vadd.f32 %v2109_v40, %v2107_v39 }
 0x35a   : > { %1406 = vadd.xlane.f32.xlu0 %v1405_v41 }
 0x3cd   : > { %v1407_v42 = vpop.xlane.xlu0 %1406 }
 0x3ce   : > { %2110 = vrcp.f32 %v1407_v42 }
 0x3d4   : > { %v2111_v43 = vpop.eup %2110 }
 0x3d5   : > { %v1409_v44 = vmul.f32 %v2111_v43, %v2107_v39  ;;  %v1410_v45 = vmul.f32 %v2111_v43, %v2109_v40 }
 0x3d7   : > { %1411 = vst [vmem:[#allocation20] sm:$0xff] %v1409_v44 }
 0x3d8   : > { %1412 = vst [vmem:[#allocation20 + $0x8] sm:$0xff] %v1410_v45 }
 0x3d9 PF: > { %p2054_p3 = scmp.eq.s32.totalorder %s2622_s25, 3  ;;  %s2517_s8 = smov [#allocation20]  }
 0x3da   : > { %s1419_s17 = sshll.u32 %s2517_s8, 4  ;;  %s2884_s15 = sld [smem:[#allocation38_spill]]  ;;  %s1420_s17 = int_to_ptr.vmem [resolvable:$true] %s1419_s17 }
 0x3e0   : > { %s1421_s5 = sshll.u32 %s2884_s15, 4  ;;  %s1422_s5 = int_to_ptr.hbm [resolvable:$true] %s1421_s5 }
 0x3e1   : > { %2002 = dma.vmem_to_hbm [thread:$0]  (%p2054_p3), %s1420_s17, 256, %s1422_s5, [#allocation5]  }
 0x3e2   : > { %2485 = dma.done.wait (%p2054_p3), [#allocation5], 256  }
 0x3e3   : > { %2487 = vsyncadd (%p2054_p3), [#allocation5], 4294967040 }
 0x3e4 PF: > { %p33_p4 = scmp.ge.s32.totalorder %s2693_s28, 6   ;;  %s2885_s18 = smov %s2494_s19 }
 0x3e5   : > { %s2886_s19 = smov %s2498_s20  ;;  %s2887_s20 = smov %s2705_s12 }
 0x3e6   : > { %s2888_s21 = smov %s2693_s28  ;;  %35 = sbr.rel (!%p33_p4) target bundleno = 21 (0x15), region = 170 }
 0x3eb   :  { %1435 = vsyncpa [#allocation4], 1 }
 0x3ec   :  { %1437 = vsyncpa [#allocation4 + $0x1], 1 }
 0x3ed   :  { %1438 = vsyncpa [#allocation7], 1 }
 0x3ee   :  { %1440 = vsyncpa [#allocation7 + $0x1], 1 }
 0x3ef   :  { %1441 = vsyncpa [#allocation10], 1 }
 0x3f0   :  { %1442 = vsyncpa [#allocation13], 1 }
 0x3f1   :  { %1443 = vsyncpa [#allocation16], 1 }
 0x3f2   :  { %1444 = vsyncpa [#allocation19], 1 }
 0x3f3   :  { %1445 = vsyncpa [#allocation5], 1 }
 0x3f4   :  { %1447 = vsyncpa [#allocation5 + $0x1], 1 }

</bundles_post_ra>
